<compile_context>
chip_gen: v7x
topology: tpu7x:2x2x1
jax: 0.10.0
libtpu: 0.0.40
codegen_flags: <defaults>
</compile_context>

<pallas_src>
import functools

import jax
import jax.numpy as jnp
from jax.experimental import pallas as pl
from jax.experimental.pallas import tpu as pltpu

# Full-f32 matmul passes so the Mosaic kernels and the XLA reference compare like-for-like.
jax.config.update("jax_default_matmul_precision", "highest")

_MATMUL_DTYPE = jnp.float32   # set to jnp.bfloat16 for more MXU throughput (looser tol)


def _round_up(x, m):
    return (x + m - 1) // m * m


def _vmem_limit_bytes():
    cap = 64 * 1024 * 1024                       # safe fallback (v7x physical VMEM)
    try:
        info = pltpu.get_tpu_info()
        cap = int(getattr(info, "vmem_capacity_bytes", cap)) or cap
    except Exception:
        pass
    # ~75% of physical VMEM, capped to leave headroom for Mosaic internal scratch.
    return max(32 * 1024 * 1024, min((cap * 3) // 4, 112 * 1024 * 1024))


_VMEM_LIMIT_BYTES = _vmem_limit_bytes()
_TILE_VMEM_BUDGET = int(_VMEM_LIMIT_BYTES * 0.7)


def _choose_tile_rows(rows, bytes_per_row, resident_bytes=0, *, max_tile=2048,
                      ensure_two_steps=True):
    """Largest multiple-of-8 row tile whose double-buffered footprint fits the budget.

    Accounts for 2x double-buffering of both streamed tiles and resident weights.
    """
    avail = _TILE_VMEM_BUDGET - 2 * resident_bytes
    t = avail // max(2 * bytes_per_row, 1)
    t = int(max(8, min(t, max_tile)))
    t = max(8, (t // 8) * 8)
    padded = _round_up(rows, 8)
    t = min(t, padded)
    if ensure_two_steps and t >= padded and padded > 8:
        # v7x has 2 TensorCores sharded over "parallel" grid axes: use >= 2 steps.
        t = _round_up((padded + 1) // 2, 8)
    return t


def _precise_recip(x):
    # EUP approximate reciprocal (otherwise-idle slot) + one Newton step for f32 accuracy.
    r = pl.reciprocal(x, approx=True)
    return r * (2.0 - x * r)


def _layernorm_rows(y, gamma, beta, eps, n):
    # torch-semantics LayerNorm: unbiased (ddof=1) std, eps added to std.
    # Two-pass centered variance (avoids catastrophic cancellation of sum(y^2) - n*mean^2).
    mean = jnp.sum(y, axis=-1, keepdims=True) * (1.0 / n)
    c = y - mean
    var = jnp.sum(c * c, axis=-1, keepdims=True) * (1.0 / (n - 1.0))
    inv = _precise_recip(jnp.sqrt(var) + eps)
    return c * (inv * gamma) + beta


def _mm(a, b):
    return jnp.dot(a.astype(_MATMUL_DTYPE), b.astype(_MATMUL_DTYPE),
                   preferred_element_type=jnp.float32)


# ---------------------------------------------------------------------------
# 1. Fused Q/K/V projections (one pallas_call, weights resident across row tiles)
# ---------------------------------------------------------------------------
def _qkv_kernel(q_ref, k_ref, v_ref,
                wq_ref, bq_ref, wk_ref, bk_ref, wv_ref, bv_ref,
                qo_ref, ko_ref, vo_ref):
    def proj(x_ref, w_ref, b_ref, o_ref):
        y = _mm(x_ref[...].astype(jnp.float32), w_ref[...].astype(jnp.float32))
        o_ref[...] = (y + b_ref[...].astype(jnp.float32)).astype(o_ref.dtype)
    proj(q_ref, wq_ref, bq_ref, qo_ref)
    proj(k_ref, wk_ref, bk_ref, ko_ref)
    proj(v_ref, wv_ref, bv_ref, vo_ref)


def qkv_projection(q2d, k2d, v2d, wq, bq, wk, bk, wv, bv):
    rows, d_model = q2d.shape
    d_qk = wq.shape[0]
    d_vv = wv.shape[0]
    wq_t, wk_t, wv_t = wq.T, wk.T, wv.T            # lane-dense output columns
    bq2, bk2, bv2 = bq.reshape(1, -1), bk.reshape(1, -1), bv.reshape(1, -1)

    bytes_per_row = 4 * (3 * d_model + 2 * d_qk + d_vv)
    resident = 4 * (d_model * (2 * d_qk + d_vv) + 2 * d_qk + d_vv)
    tile = _choose_tile_rows(rows, bytes_per_row, resident)
    padded = _round_up(rows, tile)
    if padded != rows:
        pad = ((0, padded - rows), (0, 0))
        q2d = jnp.pad(q2d, pad)
        k2d = jnp.pad(k2d, pad)
        v2d = jnp.pad(v2d, pad)

    qo, ko, vo = pl.pallas_call(
        _qkv_kernel,
        out_shape=(
            jax.ShapeDtypeStruct((padded, d_qk), q2d.dtype),
            jax.ShapeDtypeStruct((padded, d_qk), k2d.dtype),
            jax.ShapeDtypeStruct((padded, d_vv), v2d.dtype),
        ),
        grid_spec=pltpu.PrefetchScalarGridSpec(
            num_scalar_prefetch=0,
            grid=(padded // tile,),
            in_specs=[
                pl.BlockSpec((tile, d_model), lambda i: (i, 0)),
                pl.BlockSpec((tile, d_model), lambda i: (i, 0)),
                pl.BlockSpec((tile, d_model), lambda i: (i, 0)),
                pl.BlockSpec((d_model, d_qk), lambda i: (0, 0)),
                pl.BlockSpec((1, d_qk), lambda i: (0, 0)),
                pl.BlockSpec((d_model, d_qk), lambda i: (0, 0)),
                pl.BlockSpec((1, d_qk), lambda i: (0, 0)),
                pl.BlockSpec((d_model, d_vv), lambda i: (0, 0)),
                pl.BlockSpec((1, d_vv), lambda i: (0, 0)),
            ],
            out_specs=[
                pl.BlockSpec((tile, d_qk), lambda i: (i, 0)),
                pl.BlockSpec((tile, d_qk), lambda i: (i, 0)),
                pl.BlockSpec((tile, d_vv), lambda i: (i, 0)),
            ],
        ),
        compiler_params=pltpu.CompilerParams(
            dimension_semantics=("parallel",),
            vmem_limit_bytes=_VMEM_LIMIT_BYTES,
        ),
    )(q2d, k2d, v2d, wq_t, bq2, wk_t, bk2, wv_t, bv2)
    return qo[:rows], ko[:rows], vo[:rows]


# Fallback single projection (used only if len_q / len_k / len_v differ).
def _linear_kernel(x_ref, w_ref, b_ref, o_ref):
    y = _mm(x_ref[...].astype(jnp.float32), w_ref[...].astype(jnp.float32))
    o_ref[...] = (y + b_ref[...].astype(jnp.float32)).astype(o_ref.dtype)


def linear(x2d, w, b):
    rows, d_in = x2d.shape
    d_out = w.shape[0]
    wt = w.T
    b2 = b.reshape(1, d_out)
    tile = _choose_tile_rows(rows, 4 * (d_in + d_out), 4 * (d_in * d_out + d_out))
    padded = _round_up(rows, tile)
    if padded != rows:
        x2d = jnp.pad(x2d, ((0, padded - rows), (0, 0)))
    out = pl.pallas_call(
        _linear_kernel,
        out_shape=jax.ShapeDtypeStruct((padded, d_out), x2d.dtype),
        grid_spec=pltpu.PrefetchScalarGridSpec(
            num_scalar_prefetch=0,
            grid=(padded // tile,),
            in_specs=[
                pl.BlockSpec((tile, d_in), lambda i: (i, 0)),
                pl.BlockSpec((d_in, d_out), lambda i: (0, 0)),
                pl.BlockSpec((1, d_out), lambda i: (0, 0)),
            ],
            out_specs=pl.BlockSpec((tile, d_out), lambda i: (i, 0)),
        ),
        compiler_params=pltpu.CompilerParams(
            dimension_semantics=("parallel",),
            vmem_limit_bytes=_VMEM_LIMIT_BYTES,
        ),
    )(x2d, wt, b2)
    return out[:rows]


# ---------------------------------------------------------------------------
# 2. Attention: grid (batch, q_tiles); all heads of one batch per step.
#    Heads are de-interleaved with static lane slices inside the kernel; the output is
#    written back already in (sz_b, len_q, n_head*d_v) interleaved layout (single
#    lane-dense store), and attn in (n_head, sz_b, Lq, Lk) (torch head-major order).
# ---------------------------------------------------------------------------
def _attn_kernel(q_ref, k_ref, v_ref, o_ref, attn_ref, *, inv_temp, n_head, d_k, d_v):
    q = q_ref[0].astype(jnp.float32)   # (tq, n_head*d_k)
    k = k_ref[0].astype(jnp.float32)   # (Lk, n_head*d_k)
    v = v_ref[0].astype(jnp.float32)   # (Lk, n_head*d_v)

    outs = []
    for h in range(n_head):            # unrolled at trace time
        qh = q[:, h * d_k:(h + 1) * d_k]
        kh = k[:, h * d_k:(h + 1) * d_k]
        vh = v[:, h * d_v:(h + 1) * d_v]

        # s = (q @ k^T) / temperature -- contract d_k axes directly (no transpose)
        s = jax.lax.dot_general(qh.astype(_MATMUL_DTYPE), kh.astype(_MATMUL_DTYPE),
                                (((1,), (1,)), ((), ())),
                                preferred_element_type=jnp.float32) * inv_temp
        m = jnp.max(s, axis=-1, keepdims=True)
        p = jnp.exp(s - m)
        l = jnp.sum(p, axis=-1, keepdims=True)
        attn = p * _precise_recip(l)

        outs.append(_mm(attn, vh))
        attn_ref[h, 0] = attn.astype(attn_ref.dtype)

    # single lane-dense store of all heads, already interleaved as (tq, n_head*d_v)
    o_ref[0] = jnp.concatenate(outs, axis=-1).astype(o_ref.dtype)


def attention(q_proj, k_proj, v_proj, n_head, d_k, d_v, temperature):
    """q_proj: (B, Lq, H*dk), k_proj: (B, Lk, H*dk), v_proj: (B, Lk, H*dv)."""
    B, Lq, Hdk = q_proj.shape
    Lk = k_proj.shape[1]
    Hdv = v_proj.shape[2]

    # q-tile chosen from the VMEM budget (scores/attn for all heads included).
    per_qrow = 4 * (Hdk + Hdv + n_head * Lk)
    resident = 4 * Lk * (Hdk + Hdv)
    tq = _choose_tile_rows(Lq, per_qrow, resident, max_tile=1024,
                           ensure_two_steps=(B == 1))
    Lq_pad = _round_up(Lq, tq)
    if Lq_pad != Lq:
        q_proj = jnp.pad(q_proj, ((0, 0), (0, Lq_pad - Lq), (0, 0)))

    kernel = functools.partial(_attn_kernel, inv_temp=float(1.0 / temperature),
                               n_head=n_head, d_k=d_k, d_v=d_v)
    out, attn = pl.pallas_call(
        kernel,
        out_shape=(
            jax.ShapeDtypeStruct((B, Lq_pad, Hdv), q_proj.dtype),
            jax.ShapeDtypeStruct((n_head, B, Lq_pad, Lk), q_proj.dtype),
        ),
        grid_spec=pltpu.PrefetchScalarGridSpec(
            num_scalar_prefetch=0,
            grid=(B, Lq_pad // tq),
            in_specs=[
                pl.BlockSpec((1, tq, Hdk), lambda b, qi: (b, qi, 0)),
                pl.BlockSpec((1, Lk, Hdk), lambda b, qi: (b, 0, 0)),
                pl.BlockSpec((1, Lk, Hdv), lambda b, qi: (b, 0, 0)),
            ],
            out_specs=[
                pl.BlockSpec((1, tq, Hdv), lambda b, qi: (b, qi, 0)),
                pl.BlockSpec((n_head, 1, tq, Lk), lambda b, qi: (0, b, qi, 0)),
            ],
        ),
        compiler_params=pltpu.CompilerParams(
            dimension_semantics=("parallel", "parallel"),
            vmem_limit_bytes=_VMEM_LIMIT_BYTES,
        ),
    )(q_proj, k_proj, v_proj)

    out = out[:, :Lq, :]                                   # (B, Lq, H*dv), torch layout
    attn = attn[:, :, :Lq, :].reshape(n_head * B, Lq, Lk)  # head-major, matches torch
    return out, attn


# ---------------------------------------------------------------------------
# 3. fc projection + residual add + LayerNorm1 (fused)
# ---------------------------------------------------------------------------
def _fc_add_ln_kernel(x_ref, w_ref, b_ref, r_ref, g_ref, beta_ref, o_ref, *, eps, features):
    y = _mm(x_ref[...].astype(jnp.float32), w_ref[...].astype(jnp.float32))
    y = y + b_ref[...].astype(jnp.float32) + r_ref[...].astype(jnp.float32)
    o_ref[...] = _layernorm_rows(y, g_ref[...].astype(jnp.float32),
                                 beta_ref[...].astype(jnp.float32),
                                 eps, float(features)).astype(o_ref.dtype)


def fc_add_layernorm(x2d, w, b, res2d, gamma, beta, eps=1e-6):
    rows, d_in = x2d.shape
    d_out = w.shape[0]
    wt = w.T
    b2, g2, bt2 = b.reshape(1, d_out), gamma.reshape(1, d_out), beta.reshape(1, d_out)

    bytes_per_row = 4 * (d_in + 2 * d_out)
    resident = 4 * (d_in * d_out + 3 * d_out)
    tile = _choose_tile_rows(rows, bytes_per_row, resident)
    padded = _round_up(rows, tile)
    if padded != rows:
        pad = ((0, padded - rows), (0, 0))
        x2d = jnp.pad(x2d, pad)
        res2d = jnp.pad(res2d, pad)

    out = pl.pallas_call(
        functools.partial(_fc_add_ln_kernel, eps=float(eps), features=d_out),
        out_shape=jax.ShapeDtypeStruct((padded, d_out), x2d.dtype),
        grid_spec=pltpu.PrefetchScalarGridSpec(
            num_scalar_prefetch=0,
            grid=(padded // tile,),
            in_specs=[
                pl.BlockSpec((tile, d_in), lambda i: (i, 0)),
                pl.BlockSpec((d_in, d_out), lambda i: (0, 0)),
                pl.BlockSpec((1, d_out), lambda i: (0, 0)),
                pl.BlockSpec((tile, d_out), lambda i: (i, 0)),
                pl.BlockSpec((1, d_out), lambda i: (0, 0)),
                pl.BlockSpec((1, d_out), lambda i: (0, 0)),
            ],
            out_specs=pl.BlockSpec((tile, d_out), lambda i: (i, 0)),
        ),
        compiler_params=pltpu.CompilerParams(
            dimension_semantics=("parallel",),
            vmem_limit_bytes=_VMEM_LIMIT_BYTES,
        ),
    )(x2d, wt, b2, res2d, g2, bt2)
    return out[:rows]


# ---------------------------------------------------------------------------
# 4. Position-wise FFN: w1 + ReLU + w2 + residual add + LayerNorm2 (fused)
# ---------------------------------------------------------------------------
def _ffn_ln_kernel(x_ref, w1_ref, b1_ref, w2_ref, b2_ref, g_ref, beta_ref, o_ref,
                   *, eps, features):
    x = x_ref[...].astype(jnp.float32)
    h = jnp.maximum(_mm(x, w1_ref[...].astype(jnp.float32))
                    + b1_ref[...].astype(jnp.float32), 0.0)
    y = _mm(h, w2_ref[...].astype(jnp.float32)) + b2_ref[...].astype(jnp.float32) + x
    o_ref[...] = _layernorm_rows(y, g_ref[...].astype(jnp.float32),
                                 beta_ref[...].astype(jnp.float32),
                                 eps, float(features)).astype(o_ref.dtype)


def ffn_layernorm(x2d, w1, b1, w2, b2, gamma, beta, eps=1e-6):
    rows, d_model = x2d.shape
    d_hid = w1.shape[0]
    w1t, w2t = w1.T, w2.T
    b1_2, b2_2 = b1.reshape(1, d_hid), b2.reshape(1, d_model)
    g2, bt2 = gamma.reshape(1, d_model), beta.reshape(1, d_model)

    bytes_per_row = 4 * (2 * d_model + d_hid)               # x + out + hidden (in VMEM)
    resident = 4 * (2 * d_model * d_hid + d_hid + 3 * d_model)
    tile = _choose_tile_rows(rows, bytes_per_row, resident)
    padded = _round_up(rows, tile)
    if padded != rows:
        x2d = jnp.pad(x2d, ((0, padded - rows), (0, 0)))

    out = pl.pallas_call(
        functools.partial(_ffn_ln_kernel, eps=float(eps), features=d_model),
        out_shape=jax.ShapeDtypeStruct((padded, d_model), x2d.dtype),
        grid_spec=pltpu.PrefetchScalarGridSpec(
            num_scalar_prefetch=0,
            grid=(padded // tile,),
            in_specs=[
                pl.BlockSpec((tile, d_model), lambda i: (i, 0)),
                pl.BlockSpec((d_model, d_hid), lambda i: (0, 0)),
                pl.BlockSpec((1, d_hid), lambda i: (0, 0)),
                pl.BlockSpec((d_hid, d_model), lambda i: (0, 0)),
                pl.BlockSpec((1, d_model), lambda i: (0, 0)),
                pl.BlockSpec((1, d_model), lambda i: (0, 0)),
                pl.BlockSpec((1, d_model), lambda i: (0, 0)),
            ],
            out_specs=pl.BlockSpec((tile, d_model), lambda i: (i, 0)),
        ),
        compiler_params=pltpu.CompilerParams(
            dimension_semantics=("parallel",),
            vmem_limit_bytes=_VMEM_LIMIT_BYTES,
        ),
    )(x2d, w1t, b1_2, w2t, b2_2, g2, bt2)
    return out[:rows]


# ---------------------------------------------------------------------------
# Full MyMultiHeadAttention forward (eval mode: dropout = identity)
# ---------------------------------------------------------------------------
def my_multi_head_attention_forward(params, q, k, v, mask=None):
    # TODO(synk): masked-attention branch of ScaledDotProductAttention not implemented.
    assert mask is None, "mask path not implemented"

    n_head, d_k, d_v = params["n_head"], params["d_k"], params["d_v"]
    sz_b, len_q, d_model = q.shape
    len_k = k.shape[1]
    len_v = v.shape[1]

    residual2d = q.reshape(sz_b * len_q, d_model)

    # Fused QKV projection (one pallas_call) when the sequence lengths match.
    if len_q == len_k == len_v:
        q2, k2, v2 = qkv_projection(
            q.reshape(sz_b * len_q, d_model),
            k.reshape(sz_b * len_k, d_model),
            v.reshape(sz_b * len_v, d_model),
            params["w_q"], params["b_q"], params["w_k"], params["b_k"],
            params["w_v"], params["b_v"])
    else:
        q2 = linear(q.reshape(sz_b * len_q, d_model), params["w_q"], params["b_q"])
        k2 = linear(k.reshape(sz_b * len_k, d_model), params["w_k"], params["b_k"])
        v2 = linear(v.reshape(sz_b * len_v, d_model), params["w_v"], params["b_v"])

    q_proj = q2.reshape(sz_b, len_q, n_head * d_k)
    k_proj = k2.reshape(sz_b, len_k, n_head * d_k)
    v_proj = v2.reshape(sz_b, len_v, n_head * d_v)

    # Attention: no XLA transposes; output comes back already head-interleaved.
    out_heads, attn = attention(q_proj, k_proj, v_proj, n_head, d_k, d_v,
                                temperature=d_k ** 0.5)
    # attention dropout: identity (eval mode)

    # fc + dropout(identity) + residual add + LayerNorm1, fused.
    out = fc_add_layernorm(out_heads.reshape(sz_b * len_q, n_head * d_v),
                           params["fc_w"], params["fc_b"],
                           residual2d, params["ln1_g"], params["ln1_b"], eps=1e-6)

    # Position-wise feed-forward + dropout(identity) + residual + LayerNorm2, fused.
    out2 = ffn_layernorm(out, params["w1"], params["b1"], params["w2"], params["b2"],
                         params["ln2_g"], params["ln2_b"], eps=1e-6)

    return out2.reshape(sz_b, len_q, d_model), attn


# ---------------------------------------------------------------------------
# Pure-JAX reference (matches the PyTorch module in eval mode, mask=None)
# ---------------------------------------------------------------------------
def _ref_layernorm(x, g, b, eps=1e-6):
    mean = jnp.mean(x, axis=-1, keepdims=True)
    std = jnp.std(x, axis=-1, keepdims=True, ddof=1)     # torch default: unbiased
    return g * (x - mean) / (std + eps) + b


def reference_forward(params, q, k, v):
    n_head, d_k, d_v = params["n_head"], params["d_k"], params["d_v"]
    sz_b, len_q, d_model = q.shape
    len_k, len_v = k.shape[1], v.shape[1]
    residual = q

    def lin(x, w, b):
        return x @ w.T + b

    q2 = lin(q, params["w_q"], params["b_q"]).reshape(sz_b, len_q, n_head, d_k)
    k2 = lin(k, params["w_k"], params["b_k"]).reshape(sz_b, len_k, n_head, d_k)
    v2 = lin(v, params["w_v"], params["b_v"]).reshape(sz_b, len_v, n_head, d_v)

    qh = jnp.transpose(q2, (2, 0, 1, 3)).reshape(n_head * sz_b, len_q, d_k)
    kh = jnp.transpose(k2, (2, 0, 1, 3)).reshape(n_head * sz_b, len_k, d_k)
    vh = jnp.transpose(v2, (2, 0, 1, 3)).reshape(n_head * sz_b, len_v, d_v)

    logits = jnp.einsum("bqd,bkd->bqk", qh, kh) / (d_k ** 0.5)
    attn = jax.nn.softmax(logits, axis=-1)
    out_h = jnp.einsum("bqk,bkd->bqd", attn, vh)

    out = jnp.transpose(out_h.reshape(n_head, sz_b, len_q, d_v),
                        (1, 2, 0, 3)).reshape(sz_b, len_q, n_head * d_v)
    out = lin(out, params["fc_w"], params["fc_b"])
    out = _ref_layernorm(out + residual, params["ln1_g"], params["ln1_b"])

    res2 = out
    h = jnp.maximum(lin(out, params["w1"], params["b1"]), 0.0)
    h = lin(h, params["w2"], params["b2"])
    out2 = _ref_layernorm(h + res2, params["ln2_g"], params["ln2_b"])
    return out2, attn


if __name__ == "__main__":
    batch, seq, d_model, n_head, d_kv = 2, 8, 32, 4, 8
    d_k = d_v = d_kv

    key = jax.random.PRNGKey(0)
    ks = jax.random.split(key, 16)

    def nrm(kk, shape, scale):
        return scale * jax.random.normal(kk, shape, dtype=jnp.float32)

    params = {
        "n_head": n_head, "d_k": d_k, "d_v": d_v,
        "w_q": nrm(ks[0], (n_head * d_k, d_model), (2.0 / (d_model + d_k)) ** 0.5),
        "b_q": nrm(ks[1], (n_head * d_k,), 0.05),
        "w_k": nrm(ks[2], (n_head * d_k, d_model), (2.0 / (d_model + d_k)) ** 0.5),
        "b_k": nrm(ks[3], (n_head * d_k,), 0.05),
        "w_v": nrm(ks[4], (n_head * d_v, d_model), (2.0 / (d_model + d_v)) ** 0.5),
        "b_v": nrm(ks[5], (n_head * d_v,), 0.05),
        "fc_w": nrm(ks[6], (d_model, n_head * d_v), (2.0 / (d_model + n_head * d_v)) ** 0.5),
        "fc_b": nrm(ks[7], (d_model,), 0.05),
        "ln1_g": jnp.ones((d_model,), jnp.float32),
        "ln1_b": jnp.zeros((d_model,), jnp.float32),
        "w1": nrm(ks[8], (d_model, d_model), (1.0 / d_model) ** 0.5),
        "b1": nrm(ks[9], (d_model,), 0.05),
        "w2": nrm(ks[10], (d_model, d_model), (1.0 / d_model) ** 0.5),
        "b2": nrm(ks[11], (d_model,), 0.05),
        "ln2_g": jnp.ones((d_model,), jnp.float32),
        "ln2_b": jnp.zeros((d_model,), jnp.float32),
    }

    q = jax.random.normal(ks[12], (batch, seq, d_model), dtype=jnp.float32)
    k = jax.random.normal(ks[13], (batch, seq, d_model), dtype=jnp.float32)
    v = jax.random.normal(ks[14], (batch, seq, d_model), dtype=jnp.float32)

    out, attn = my_multi_head_attention_forward(params, q, k, v, mask=None)
    out = jax.block_until_ready(out)
    attn = jax.block_until_ready(attn)

    ref_out, ref_attn = reference_forward(params, q, k, v)
    assert out.shape == (batch, seq, d_model)
    assert attn.shape == (n_head * batch, seq, seq)
    assert jnp.allclose(attn, ref_attn, atol=1e-3, rtol=1e-3), "attn mismatch vs reference"
    assert jnp.allclose(out, ref_out, atol=1e-3, rtol=1e-3), "output mismatch vs reference"

    print("KERNEL_OK")
</pallas_src>

<mosaic_0001>
module attributes {stable_mosaic.version = 11 : i64} {
  func.func @_qkv_kernel(%arg0: i32, %arg1: memref<8x32xf32, #tpu.memory_space<vmem>>, %arg2: memref<8x32xf32, #tpu.memory_space<vmem>>, %arg3: memref<8x32xf32, #tpu.memory_space<vmem>>, %arg4: memref<32x32xf32, #tpu.memory_space<vmem>>, %arg5: memref<1x32xf32, #tpu.memory_space<vmem>>, %arg6: memref<32x32xf32, #tpu.memory_space<vmem>>, %arg7: memref<1x32xf32, #tpu.memory_space<vmem>>, %arg8: memref<32x32xf32, #tpu.memory_space<vmem>>, %arg9: memref<1x32xf32, #tpu.memory_space<vmem>>, %arg10: memref<8x32xf32, #tpu.memory_space<vmem>>, %arg11: memref<8x32xf32, #tpu.memory_space<vmem>>, %arg12: memref<8x32xf32, #tpu.memory_space<vmem>>) attributes {dimension_semantics = [#tpu.dimension_semantics<parallel>], iteration_bounds = array<i64: 2>, scalar_prefetch = 0 : i64, scratch_operands = 0 : i64, tpu.core_type = #tpu.core_type<tc>, window_params = [{transform_indices = @transform_0, window_bounds = array<i64: 8, 32>}, {transform_indices = @transform_1, window_bounds = array<i64: 8, 32>}, {transform_indices = @transform_2, window_bounds = array<i64: 8, 32>}, {pipeline_mode = #tpu.pipeline_mode<synchronous>, transform_indices = @transform_3, window_bounds = array<i64: 32, 32>}, {pipeline_mode = #tpu.pipeline_mode<synchronous>, transform_indices = @transform_4, window_bounds = array<i64: 1, 32>}, {pipeline_mode = #tpu.pipeline_mode<synchronous>, transform_indices = @transform_5, window_bounds = array<i64: 32, 32>}, {pipeline_mode = #tpu.pipeline_mode<synchronous>, transform_indices = @transform_6, window_bounds = array<i64: 1, 32>}, {pipeline_mode = #tpu.pipeline_mode<synchronous>, transform_indices = @transform_7, window_bounds = array<i64: 32, 32>}, {pipeline_mode = #tpu.pipeline_mode<synchronous>, transform_indices = @transform_8, window_bounds = array<i64: 1, 32>}, {transform_indices = @transform_9, window_bounds = array<i64: 8, 32>}, {transform_indices = @transform_10, window_bounds = array<i64: 8, 32>}, {transform_indices = @transform_11, window_bounds = array<i64: 8, 32>}]} {
    %c0 = arith.constant 0 : index
    %c0_0 = arith.constant 0 : index
    %0 = vector.load %arg1[%c0, %c0_0] : memref<8x32xf32, #tpu.memory_space<vmem>>, vector<8x32xf32>
    %c0_1 = arith.constant 0 : index
    %c0_2 = arith.constant 0 : index
    %1 = vector.load %arg4[%c0_1, %c0_2] : memref<32x32xf32, #tpu.memory_space<vmem>>, vector<32x32xf32>
    %cst = arith.constant dense<0.000000e+00> : vector<8x32xf32>
    %2 = tpu.matmul %0, %1, %cst {dimension_numbers = #tpu.dot_dimension_numbers<[1], [0], [0], [1], [0, 0, 1, 1], [], []>, precision = #tpu.contract_precision<fp32>} : vector<8x32xf32>, vector<32x32xf32>, vector<8x32xf32> -> vector<8x32xf32>
    %c0_3 = arith.constant 0 : index
    %c0_4 = arith.constant 0 : index
    %3 = vector.load %arg5[%c0_3, %c0_4] : memref<1x32xf32, #tpu.memory_space<vmem>>, vector<1x32xf32>
    %4 = vector.broadcast %3 : vector<1x32xf32> to vector<8x32xf32>
    %5 = arith.addf %2, %4 : vector<8x32xf32>
    %c0_5 = arith.constant 0 : index
    %c0_6 = arith.constant 0 : index
    %6 = vector.load %arg10[%c0_5, %c0_6] : memref<8x32xf32, #tpu.memory_space<vmem>>, vector<8x32xf32>
    tpu.vector_store %arg10[%c0_5, %c0_6], %5 {strides = array<i32>} : memref<8x32xf32, #tpu.memory_space<vmem>>, vector<8x32xf32>,
    %c0_7 = arith.constant 0 : index
    %c0_8 = arith.constant 0 : index
    %7 = vector.load %arg2[%c0_7, %c0_8] : memref<8x32xf32, #tpu.memory_space<vmem>>, vector<8x32xf32>
    %c0_9 = arith.constant 0 : index
    %c0_10 = arith.constant 0 : index
    %8 = vector.load %arg6[%c0_9, %c0_10] : memref<32x32xf32, #tpu.memory_space<vmem>>, vector<32x32xf32>
    %cst_11 = arith.constant dense<0.000000e+00> : vector<8x32xf32>
    %9 = tpu.matmul %7, %8, %cst_11 {dimension_numbers = #tpu.dot_dimension_numbers<[1], [0], [0], [1], [0, 0, 1, 1], [], []>, precision = #tpu.contract_precision<fp32>} : vector<8x32xf32>, vector<32x32xf32>, vector<8x32xf32> -> vector<8x32xf32>
    %c0_12 = arith.constant 0 : index
    %c0_13 = arith.constant 0 : index
    %10 = vector.load %arg7[%c0_12, %c0_13] : memref<1x32xf32, #tpu.memory_space<vmem>>, vector<1x32xf32>
    %11 = vector.broadcast %10 : vector<1x32xf32> to vector<8x32xf32>
    %12 = arith.addf %9, %11 : vector<8x32xf32>
    %c0_14 = arith.constant 0 : index
    %c0_15 = arith.constant 0 : index
    %13 = vector.load %arg11[%c0_14, %c0_15] : memref<8x32xf32, #tpu.memory_space<vmem>>, vector<8x32xf32>
    tpu.vector_store %arg11[%c0_14, %c0_15], %12 {strides = array<i32>} : memref<8x32xf32, #tpu.memory_space<vmem>>, vector<8x32xf32>,
    %c0_16 = arith.constant 0 : index
    %c0_17 = arith.constant 0 : index
    %14 = vector.load %arg3[%c0_16, %c0_17] : memref<8x32xf32, #tpu.memory_space<vmem>>, vector<8x32xf32>
    %c0_18 = arith.constant 0 : index
    %c0_19 = arith.constant 0 : index
    %15 = vector.load %arg8[%c0_18, %c0_19] : memref<32x32xf32, #tpu.memory_space<vmem>>, vector<32x32xf32>
    %cst_20 = arith.constant dense<0.000000e+00> : vector<8x32xf32>
    %16 = tpu.matmul %14, %15, %cst_20 {dimension_numbers = #tpu.dot_dimension_numbers<[1], [0], [0], [1], [0, 0, 1, 1], [], []>, precision = #tpu.contract_precision<fp32>} : vector<8x32xf32>, vector<32x32xf32>, vector<8x32xf32> -> vector<8x32xf32>
    %c0_21 = arith.constant 0 : index
    %c0_22 = arith.constant 0 : index
    %17 = vector.load %arg9[%c0_21, %c0_22] : memref<1x32xf32, #tpu.memory_space<vmem>>, vector<1x32xf32>
    %18 = vector.broadcast %17 : vector<1x32xf32> to vector<8x32xf32>
    %19 = arith.addf %16, %18 : vector<8x32xf32>
    %c0_23 = arith.constant 0 : index
    %c0_24 = arith.constant 0 : index
    %20 = vector.load %arg12[%c0_23, %c0_24] : memref<8x32xf32, #tpu.memory_space<vmem>>, vector<8x32xf32>
    tpu.vector_store %arg12[%c0_23, %c0_24], %19 {strides = array<i32>} : memref<8x32xf32, #tpu.memory_space<vmem>>, vector<8x32xf32>,
    return
  }
  func.func @transform_0(%arg0: i32) -> (i32, i32) {
    %c0_i32 = arith.constant 0 : i32
    %c0_i32_0 = arith.constant 0 : i32
    return %arg0, %c0_i32 : i32, i32
  }
  func.func @transform_1(%arg0: i32) -> (i32, i32) {
    %c0_i32 = arith.constant 0 : i32
    %c0_i32_0 = arith.constant 0 : i32
    return %arg0, %c0_i32 : i32, i32
  }
  func.func @transform_2(%arg0: i32) -> (i32, i32) {
    %c0_i32 = arith.constant 0 : i32
    %c0_i32_0 = arith.constant 0 : i32
    return %arg0, %c0_i32 : i32, i32
  }
  func.func @transform_3(%arg0: i32) -> (i32, i32) {
    %c0_i32 = arith.constant 0 : i32
    %c0_i32_0 = arith.constant 0 : i32
    %c0_i32_1 = arith.constant 0 : i32
    return %c0_i32, %c0_i32_0 : i32, i32
  }
  func.func @transform_4(%arg0: i32) -> (i32, i32) {
    %c0_i32 = arith.constant 0 : i32
    %c0_i32_0 = arith.constant 0 : i32
    %c0_i32_1 = arith.constant 0 : i32
    return %c0_i32, %c0_i32_0 : i32, i32
  }
  func.func @transform_5(%arg0: i32) -> (i32, i32) {
    %c0_i32 = arith.constant 0 : i32
    %c0_i32_0 = arith.constant 0 : i32
    %c0_i32_1 = arith.constant 0 : i32
    return %c0_i32, %c0_i32_0 : i32, i32
  }
  func.func @transform_6(%arg0: i32) -> (i32, i32) {
    %c0_i32 = arith.constant 0 : i32
    %c0_i32_0 = arith.constant 0 : i32
    %c0_i32_1 = arith.constant 0 : i32
    return %c0_i32, %c0_i32_0 : i32, i32
  }
  func.func @transform_7(%arg0: i32) -> (i32, i32) {
    %c0_i32 = arith.constant 0 : i32
    %c0_i32_0 = arith.constant 0 : i32
    %c0_i32_1 = arith.constant 0 : i32
    return %c0_i32, %c0_i32_0 : i32, i32
  }
  func.func @transform_8(%arg0: i32) -> (i32, i32) {
    %c0_i32 = arith.constant 0 : i32
    %c0_i32_0 = arith.constant 0 : i32
    %c0_i32_1 = arith.constant 0 : i32
    return %c0_i32, %c0_i32_0 : i32, i32
  }
  func.func @transform_9(%arg0: i32) -> (i32, i32) {
    %c0_i32 = arith.constant 0 : i32
    %c0_i32_0 = arith.constant 0 : i32
    return %arg0, %c0_i32 : i32, i32
  }
  func.func @transform_10(%arg0: i32) -> (i32, i32) {
    %c0_i32 = arith.constant 0 : i32
    %c0_i32_0 = arith.constant 0 : i32
    return %arg0, %c0_i32 : i32, i32
  }
  func.func @transform_11(%arg0: i32) -> (i32, i32) {
    %c0_i32 = arith.constant 0 : i32
    %c0_i32_0 = arith.constant 0 : i32
    return %arg0, %c0_i32 : i32, i32
  }
}

</mosaic_0001>

<bundles_post_ra>
// kernel: tpu_custom_call.1
= control target key start
LH: loop header
LB: loop body
LE: loop exit
PB: predicated region body
PF: predicated region fallthrough
CT: control target
= control target key end

     0   :  { %s3939_s0 = inlined_call_operand.hbm [shape: f32[16,32], index: 0, kind: input, shape index: {}]   ;;  %s3940_s1 = inlined_call_operand.hbm [shape: f32[16,32], index: 1, kind: input, shape index: {}]   ;;  %s3941_s2 = inlined_call_operand.hbm [shape: f32[16,32], index: 2, kind: input, shape index: {}]   ;;  %s3942_s3 = inlined_call_operand.hbm [shape: f32[32,32], index: 3, kind: input, shape index: {}]   ;;  %s3943_s4 = inlined_call_operand.vmem [shape: f32[1,32], index: 4, kind: input, shape index: {}]   ;;  %s3944_s5 = inlined_call_operand.hbm [shape: f32[32,32], index: 5, kind: input, shape index: {}]   ;;  %s3945_s6 = inlined_call_operand.vmem [shape: f32[1,32], index: 6, kind: input, shape index: {}]   ;;  %s3946_s7 = inlined_call_operand.hbm [shape: f32[32,32], index: 7, kind: input, shape index: {}]   ;;  %s3947_s8 = inlined_call_operand.vmem [shape: f32[1,32], index: 8, kind: input, shape index: {}]   ;;  %s3948_s9 = inlined_call_operand.hbm [shape: f32[16,32], index: 9, kind: output, shape index: {0}]   ;;  %s3949_s10 = inlined_call_operand.hbm [shape: f32[16,32], index: 10, kind: output, shape index: {1}]   ;;  %s3950_s11 = inlined_call_operand.hbm [shape: f32[16,32], index: 11, kind: output, shape index: {2}]  }
   0x1   :  { %3978 = sst [smem:[#allocation28_spill]] %s3940_s1 }
   0x2   :  { %3979 = sst [smem:[#allocation29_spill]] %s3942_s3 }
   0x3   :  { %3980 = sst [smem:[#allocation30_spill]] %s3945_s6 }
   0x4   :  { %3981 = sst [smem:[#allocation31_spill]] %s3947_s8 }
   0x5   :  { %3982 = sst [smem:[#allocation32_spill]] %s3948_s9 }
   0x6   :  { %3983 = sst [smem:[#allocation33_spill]] %s3949_s10 }
   0x7   :  { %3984 = sst [smem:[#allocation34_spill]] %s3950_s11 }
   0x8   :  { %17 = vsyncpa [#allocation3], 0 }
   0x9   :  { %19 = vsyncpa [#allocation3 + $0x1], 0 }
   0xa   :  { %20 = vsyncpa [#allocation6], 0 }
   0xb   :  { %22 = vsyncpa [#allocation6 + $0x1], 0 }
   0xc   :  { %23 = vsyncpa [#allocation9], 0 }
   0xd   :  { %24 = vsyncpa [#allocation12], 0 }
   0xe   :  { %25 = vsyncpa [#allocation4], 0 }
   0xf   :  { %27 = vsyncpa [#allocation4 + $0x1], 0 }
  0x10   :  { %28 = vsyncpa [#allocation15], 0 }
  0x11   :  { %30 = vsyncpa [#allocation15 + $0x1], 0  ;;  %s3243_s17 = smov 0   ;;  %s3245_s18 = smov 0  }
  0x12   :  { %s3247_s19 = smov 0   ;;  %s3249_s20 = smov 0  }
  0x13 LB: > { %3985 = sst [smem:[#allocation23_spill]] %s3155_s17  ;;  %s3264_s21 = sadd.s32 4294967295, %s3167_s20   ;;  %s3167_s20 = sphi %s3249_s20, %s4028_s20   ;;  %s3163_s19 = sphi %s3247_s19, %s4032_s19   ;;  %s3159_s18 = sphi %s3245_s18, %s4031_s18   ;;  %s3155_s17 = sphi %s3243_s17, %s4030_s17  }
  0x14   : > { %3986 = sst [smem:[#allocation24_spill]] %s3167_s20  ;;  %s3951_s22 = sadd.s32 4294967294, %s3167_s20  }
  0x15   : > { %p56_p0 = scmp.ne.s32.totalorder %s3159_s18, %s3155_s17  ;;  %p3954_p1 = scmp.eq.s32.totalorder %s3264_s21, 0 }
  0x16   : > { %p264_p3 = scmp.eq.s32.totalorder %s3951_s22, 1  ;;  %p2293_p5 = scmp.ge.s32.totalorder %s3167_s20, 1 }
  0x17   : > { %p3275_p4 = por %p3954_p1, %p56_p0  ;;  %p323_p7 = scmp.lt.s32.totalorder %s3167_s20, 3 }
  0x18   : > { %p3280_p6 = por %p264_p3, %p56_p0  ;;  %s3169_s26 = smov [#allocation8]  }
  0x19   : > { %s3987_s23 = scalar_select %p3275_p4, 1, 0 }
  0x1a   : > { %s3988_s24 = scalar_select %p3280_p6, 1, 0 }
  0x1b   : > { %p3285_p8 = pnand %p2293_p5, %p323_p7  ;;  %s335_s27 = sshll.u32 %s3169_s26, 4  ;;  %s3289_s27 = int_to_ptr.vmem [resolvable:$true] %s335_s27 }
  0x1c   : > { %3989 = sst [smem:[#allocation25_spill]] %s3988_s24  ;;  %s3301_s29 = sadd.s32 1, %s3167_s20  }
  0x1d   : > { %s3990_s25 = scalar_select %p3285_p8, 1, 0 }
  0x1e   : > { %p2777_p9 = pneg %p3285_p8  ;;  %3992 = sst [smem:[#allocation26_spill]] %s3301_s29 }
  0x1f   : > { %s43_s30 = sadd.s32 1, %s3163_s19  ;;  %s40_s12 = ssub.s32 %s3167_s20, %s3301_s29 }
  0x20   : > { %p3296_p11 = pnand %p2777_p9, %p3954_p1  ;;  %s3993_s3 = sld [smem:[#allocation29_spill]] }
  0x22   : > { %s3991_s28 = scalar_select %p3296_p11, 1, 0 }
  0x23   : > { %p3314_p13 = pneg %p3296_p11 }
  0x25   : > { %s3994_s22 = scalar_select %p3314_p13, 1, 0 }
  0x26   : > { %s2855_s15 = scalar_lea.hbm %s3993_s3, 512 }
  0x27   : > { %p2856_p12 = scmp.ne.s32.totalorder %s3993_s3, %s2855_s15  ;;  %p2862_p5 = scmp.lt.u32.totalorder %s2855_s15, %s3993_s3 }
  0x29   : > { %p2858_p0 = pnand %p3314_p13, %p2856_p12 }
  0x2b   : > { %p2859_p3 = pneg %p2858_p0 }
  0x2d   : > { %p2864_p7 = pnand %p2862_p5, %p2859_p3 }
  0x2f   : > { %2867 = shalt.err (!%p2864_p7)
}
  0x30   : > { %s2868_s13 = scalar_lea.vmem %s3289_s27, 512  ;;  %p2876_p2 = scmp.lt.s32.totalorder %s3289_s27, %s3289_s27 }
  0x31   : > { %p2869_p9 = scmp.ne.s32.totalorder %s3289_s27, %s2868_s13  ;;  %p2877_p6 = scmp.lt.s32.totalorder %s2868_s13, %s2868_s13 }
  0x33   : > { %p2871_p10 = pnand %p2869_p9, %p3314_p13  ;;  %p2878_p12 = por %p2877_p6, %p2876_p2 }
  0x35   : > { %p2872_p1 = pneg %p2871_p10 }
  0x37   : > { %p2879_p0 = pnand %p2878_p12, %p2872_p1 }
  0x39   : > { %2882 = shalt.err (!%p2879_p0)
}
  0x3a   : > { %s3958_s14 = smov 128   ;;  %s3960_s17 = smov 8  }
  0x3b   : > { %2780 = dma.hbm_to_vmem [thread:$0]  (!%p3296_p11), %s3993_s3, 512, %s3289_s27, [#allocation9], %s3958_s14, %s3958_s14, %s3960_s17  }
  0x3c   : > { %p41_p1 = scmp.eq.s32.totalorder %s40_s12, 0  ;;  %p50_p2 = scmp.ne.s32.totalorder %s3163_s19, %s3159_s18 }
  0x3d   : > { %p51_p6 = scmp.eq.s32.totalorder %s3167_s20, 0  ;;  %p2810_p10 = scmp.lt.s32.totalorder %s3167_s20, 2 }
  0x3e   : > { %s3343_s16 = scalar_select %p41_p1, %s3163_s19, %s43_s30  }
  0x3f   : > { %p52_p3 = por %p51_p6, %p50_p2  ;;  %p3996_p5 = scmp.eq.s32.totalorder %s3264_s21, 1 }
  0x40   : > { %3995 = sst [smem:[#allocation27_spill]] %s3343_s16  ;;  %s3962_s13 = sand.u32 1, %s3163_s19  }
  0x41   : > { %p3347_p7 = por %p3996_p5, %p50_p2  ;;  %s3353_s29 = sshll.u32 %s3167_s20, 7 }
  0x42   : > { %s3357_s11 = sshll.u32 %s3962_s13, 3  ;;  %p3359_p9 = pnand %p2810_p10, %p52_p3 }
  0x43   : > { %s3997_s26 = scalar_select %p3347_p7, 1, 0 }
  0x44   : > { %s3998_s27 = scalar_select %p3359_p9, 1, 0 }
  0x45   : > { %s402_s30 = sand.u32 1, %s3167_s20   ;;  %s3999_s1 = sld [smem:[#allocation28_spill]] }
  0x46   : > { %s406_s14 = scalar_lea.vmem [#allocation5], %s3357_s11  ;;  %s3373_s13 = scalar_lea.sflag [#allocation6], %s402_s30 }
  0x47   : > { %s413_s17 = sshll.u32 %s406_s14, 4  ;;  %p3379_p0 = pneg %p3359_p9  ;;  %s3371_s17 = int_to_ptr.vmem [resolvable:$true] %s413_s17 }
  0x49   : > { %s4000_s16 = scalar_select %p3379_p0, 1, 0 }
  0x4b   : > { %s3368_s15 = scalar_lea.hbm %s3999_s1, %s3353_s29  ;;  %s2888_s20 = scalar_lea.hbm %s3999_s1, 256 }
  0x4c   : > { %s2883_s3 = scalar_lea.hbm %s3368_s15, 128  ;;  %p2889_p6 = scmp.lt.u32.totalorder %s3368_s15, %s3999_s1 }
  0x4d   : > { %p2884_p12 = scmp.ne.s32.totalorder %s3368_s15, %s2883_s3  ;;  %p2890_p10 = scmp.lt.u32.totalorder %s2888_s20, %s2883_s3 }
  0x4e   : > { %p2892_p5 = scmp.lt.u32.totalorder %s2883_s3, %s3368_s15 }
  0x4f   : > { %p2886_p1 = pnand %p3379_p0, %p2884_p12  ;;  %p2891_p3 = por %p2890_p10, %p2889_p6 }
  0x51   : > { %p2887_p2 = pneg %p2886_p1  ;;  %p2893_p7 = por %p2892_p5, %p2891_p3 }
  0x53   : > { %p2894_p4 = pnand %p2893_p7, %p2887_p2 }
  0x55   : > { %2897 = shalt.err (!%p2894_p4)
}
  0x56   : > { %s2898_s30 = scalar_lea.vmem %s3371_s17, 128  ;;  %s3172_s12 = smov [#allocation5]  }
  0x57   : > { %p2899_p12 = scmp.ne.s32.totalorder %s3371_s17, %s2898_s30  ;;  %s2903_s24 = sshll.u32 %s3172_s12, 4  ;;  %s2904_s24 = int_to_ptr.vmem [resolvable:$false] %s2903_s24 }
  0x58   : > { %s2905_s10 = scalar_lea.vmem %s2904_s24, 256  ;;  %p2906_p11 = scmp.lt.s32.totalorder %s3371_s17, %s2904_s24 }
  0x59   : > { %p2901_p1 = pnand %p2899_p12, %p3379_p0  ;;  %p2907_p13 = scmp.lt.s32.totalorder %s2905_s10, %s2898_s30 }
  0x5b   : > { %p2902_p8 = pneg %p2901_p1  ;;  %p2908_p6 = por %p2907_p13, %p2906_p11 }
  0x5d   : > { %p2909_p10 = pnand %p2908_p6, %p2902_p8 }
  0x5f   : > { %2912 = shalt.err (!%p2909_p10)
}
  0x60   : > { %2793 = dma.hbm_to_vmem [thread:$0]  (!%p3359_p9), %s3368_s15, 128, %s3371_s17, %s3373_s13  }
  0x61   : > { %s3173_s3 = smov [#allocation10]   ;;  %s3174_s14 = smov [#allocation11]  }
  0x62   : > { %s351_s20 = sshll.u32 %s3173_s3, 4  ;;  %s367_s1 = sshll.u32 %s3174_s14, 4  ;;  %s352_s20 = int_to_ptr.vmem [resolvable:$true] %s351_s20  ;;  %s368_s1 = int_to_ptr.vmem [resolvable:$true] %s367_s1 }
  0x63   : > { %s2913_s24 = scalar_lea.hbm %s3944_s5, 512  ;;  %p4001_p8 = scmp.ne.s32.totalorder %s3994_s22, 0 }
  0x64   : > { %p2914_p4 = scmp.ne.s32.totalorder %s3944_s5, %s2913_s24  ;;  %p2920_p7 = scmp.lt.u32.totalorder %s2913_s24, %s3944_s5 }
  0x66   : > { %p2916_p11 = pnand %p2914_p4, %p4001_p8 }
  0x68   : > { %p2917_p13 = pneg %p2916_p11 }
  0x6a   : > { %p2922_p2 = pnand %p2920_p7, %p2917_p13 }
  0x6c   : > { %2925 = shalt.err (!%p2922_p2)
}
  0x6d   : > { %s2926_s17 = scalar_lea.vmem %s352_s20, 512  ;;  %p2934_p1 = scmp.lt.s32.totalorder %s352_s20, %s352_s20 }
  0x6e   : > { %p2927_p3 = scmp.ne.s32.totalorder %s352_s20, %s2926_s17  ;;  %p2935_p6 = scmp.lt.s32.totalorder %s2926_s17, %s2926_s17 }
  0x70   : > { %p2929_p5 = pnand %p2927_p3, %p4001_p8  ;;  %p2936_p10 = por %p2935_p6, %p2934_p1 }
  0x72   : > { %p2930_p12 = pneg %p2929_p5 }
  0x74   : > { %p2937_p9 = pnand %p2936_p10, %p2930_p12 }
  0x76   : > { %2940 = shalt.err (!%p2937_p9)
}
  0x77   : > { %p4002_p4 = scmp.ne.s32.totalorder %s3991_s28, 0  ;;  %s4003_s6 = smov 8  }
  0x78   : > { %s4004_s15 = smov 128   ;;  %s2941_s12 = scalar_lea.hbm %s3946_s7, 512 }
  0x79   : > { %2783 = dma.hbm_to_vmem [thread:$0]  (!%p4002_p4), %s3944_s5, 512, %s352_s20, [#allocation9], %s4004_s15, %s4004_s15, %s4003_s6  }
  0x7a   : > { %p2942_p11 = scmp.ne.s32.totalorder %s3946_s7, %s2941_s12  ;;  %p2948_p7 = scmp.lt.u32.totalorder %s2941_s12, %s3946_s7 }
  0x7c   : > { %p2944_p9 = pnand %p2942_p11, %p4001_p8 }
  0x7e   : > { %p2945_p13 = pneg %p2944_p9 }
  0x80   : > { %p2950_p2 = pnand %p2948_p7, %p2945_p13 }
  0x82   : > { %2953 = shalt.err (!%p2950_p2)
}
  0x83   : > { %s2954_s8 = scalar_lea.vmem %s368_s1, 512  ;;  %p2962_p1 = scmp.lt.s32.totalorder %s368_s1, %s368_s1 }
  0x84   : > { %p2955_p3 = scmp.ne.s32.totalorder %s368_s1, %s2954_s8  ;;  %p2963_p6 = scmp.lt.s32.totalorder %s2954_s8, %s2954_s8 }
  0x86   : > { %p2957_p5 = pnand %p2955_p3, %p4001_p8  ;;  %p2964_p10 = por %p2963_p6, %p2962_p1 }
  0x88   : > { %p2958_p12 = pneg %p2957_p5 }
  0x8a   : > { %p2965_p0 = pnand %p2964_p10, %p2958_p12 }
  0x8c   : > { %2968 = shalt.err (!%p2965_p0)
}
  0x8d   : > { %2786 = dma.hbm_to_vmem [thread:$0]  (!%p4002_p4), %s3946_s7, 512, %s368_s1, [#allocation12], %s4004_s15, %s4004_s15, %s4003_s6  }
  0x8e   : > { %s3449_s14 = scalar_lea.hbm %s3939_s0, %s3353_s29  ;;  %s388_s28 = scalar_lea.vmem [#allocation2], %s3357_s11 }
  0x8f   : > { %s395_s12 = sshll.u32 %s388_s28, 4  ;;  %s3458_s10 = scalar_lea.hbm %s3941_s2, %s3353_s29  ;;  %s3452_s12 = int_to_ptr.vmem [resolvable:$true] %s395_s12 }
  0x90   : > { %s4005_s17 = sand.u32 1, %s3163_s19   ;;  %s2969_s6 = scalar_lea.hbm %s3449_s14, 128 }
  0x91   : > { %s385_s1 = scalar_lea.sflag [#allocation3], %s4005_s17  ;;  %p2970_p0 = scmp.ne.s32.totalorder %s3449_s14, %s2969_s6 }
  0x92   : > { %p4006_p8 = scmp.ne.s32.totalorder %s4000_s16, 0  ;;  %s2974_s20 = scalar_lea.hbm %s3939_s0, 256 }
  0x93   : > { %p2975_p9 = scmp.lt.u32.totalorder %s3449_s14, %s3939_s0  ;;  %p2976_p13 = scmp.lt.u32.totalorder %s2974_s20, %s2969_s6 }
  0x94   : > { %p2972_p4 = pnand %p2970_p0, %p4006_p8  ;;  %p2978_p2 = scmp.lt.u32.totalorder %s2969_s6, %s3449_s14 }
  0x95   : > { %p2977_p7 = por %p2976_p13, %p2975_p9 }
  0x96   : > { %p2973_p11 = pneg %p2972_p4 }
  0x97   : > { %p2979_p3 = por %p2978_p2, %p2977_p7 }
  0x99   : > { %p2980_p5 = pnand %p2979_p3, %p2973_p11 }
  0x9b   : > { %2983 = shalt.err (!%p2980_p5)
}
  0x9c   : > { %s2984_s29 = scalar_lea.vmem %s3452_s12, 128  ;;  %s3175_s3 = smov [#allocation2]  }
  0x9d   : > { %p2985_p12 = scmp.ne.s32.totalorder %s3452_s12, %s2984_s29  ;;  %s2989_s28 = sshll.u32 %s3175_s3, 4  ;;  %s2990_s28 = int_to_ptr.vmem [resolvable:$false] %s2989_s28 }
  0x9e   : > { %s2991_s24 = scalar_lea.vmem %s2990_s28, 256  ;;  %p2992_p10 = scmp.lt.s32.totalorder %s3452_s12, %s2990_s28 }
  0x9f   : > { %p2987_p1 = pnand %p2985_p12, %p4006_p8  ;;  %p2993_p0 = scmp.lt.s32.totalorder %s2991_s24, %s2984_s29 }
  0xa1   : > { %p2988_p6 = pneg %p2987_p1  ;;  %p2994_p4 = por %p2993_p0, %p2992_p10 }
  0xa3   : > { %p2995_p9 = pnand %p2994_p4, %p2988_p6 }
  0xa5   : > { %2998 = shalt.err (!%p2995_p9)
}
  0xa6   : > { %p4007_p11 = scmp.ne.s32.totalorder %s3998_s27, 0  ;;  %s424_s30 = scalar_lea.vmem [#allocation7], %s3357_s11 }
  0xa7   : > { %s431_s17 = sshll.u32 %s424_s30, 4  ;;  %s2999_s6 = scalar_lea.hbm %s3458_s10, 128  ;;  %s432_s17 = int_to_ptr.vmem [resolvable:$true] %s431_s17 }
  0xa8   : > { %2790 = dma.hbm_to_vmem [thread:$0]  (!%p4007_p11), %s3449_s14, 128, %s3452_s12, %s385_s1  }
  0xa9   : > { %p3000_p13 = scmp.ne.s32.totalorder %s3458_s10, %s2999_s6  ;;  %s3004_s20 = scalar_lea.hbm %s3941_s2, 256 }
  0xaa   : > { %p3005_p3 = scmp.lt.u32.totalorder %s3458_s10, %s3941_s2  ;;  %p3006_p5 = scmp.lt.u32.totalorder %s3004_s20, %s2999_s6 }
  0xab   : > { %p3002_p7 = pnand %p3000_p13, %p4006_p8  ;;  %p3008_p1 = scmp.lt.u32.totalorder %s2999_s6, %s3458_s10 }
  0xac   : > { %p3007_p12 = por %p3006_p5, %p3005_p3 }
  0xad   : > { %p3003_p2 = pneg %p3002_p7 }
  0xae   : > { %p3009_p6 = por %p3008_p1, %p3007_p12 }
  0xb0   : > { %p3010_p10 = pnand %p3009_p6, %p3003_p2 }
  0xb2   : > { %3013 = shalt.err (!%p3010_p10)
}
  0xb3   : > { %s3014_s11 = scalar_lea.vmem %s432_s17, 128  ;;  %s3176_s14 = smov [#allocation7]  }
  0xb4   : > { %p3015_p0 = scmp.ne.s32.totalorder %s432_s17, %s3014_s11  ;;  %s3019_s12 = sshll.u32 %s3176_s14, 4  ;;  %s3020_s12 = int_to_ptr.vmem [resolvable:$false] %s3019_s12 }
  0xb5   : > { %s3021_s1 = scalar_lea.vmem %s3020_s12, 256  ;;  %p3022_p13 = scmp.lt.s32.totalorder %s432_s17, %s3020_s12 }
  0xb6   : > { %p3017_p4 = pnand %p3015_p0, %p4006_p8  ;;  %p3023_p7 = scmp.lt.s32.totalorder %s3021_s1, %s3014_s11 }
  0xb8   : > { %p3018_p9 = pneg %p3017_p4  ;;  %p3024_p11 = por %p3023_p7, %p3022_p13 }
  0xba   : > { %p3025_p3 = pnand %p3024_p11, %p3018_p9 }
  0xbc   : > { %3028 = shalt.err (!%p3025_p3)
}
  0xbd   : > { %p4008_p5 = scmp.ne.s32.totalorder %s3998_s27, 0  ;;  %p4009_p2 = scmp.ne.s32.totalorder %s3990_s25, 0 }
  0xbe   : > { %s3505_s16 = sand.u32 (!%p4009_p2), 1, %s3159_s18   ;;  %p4010_p8 = scmp.ne.s32.totalorder (!%p4009_p2), %s3987_s23, 0 }
  0xbf   : > { %2796 = dma.hbm_to_vmem [thread:$0]  (!%p4008_p5), %s3458_s10, 128, %s432_s17, %s3373_s13  }
  0xc0   : > { %440 = sbr.rel (%p4009_p2) target bundleno = 537 (0x219), region = 56  ;;  %s3508_s29 = sshll.u32 (!%p4009_p2), %s3505_s16, 3 }
  0xc1   : > { %s443_s3 = scalar_lea.sflag (!%p4009_p2), [#allocation3], %s3505_s16  ;;  %s446_s28 = scalar_lea.vmem (!%p4009_p2), [#allocation2], %s3508_s29 }
  0xc7   : > { %3130 = dma.done.wait (%p4010_p8), %s443_s3, 128  }
  0xc8   : > { %3132 = vsyncadd (%p4010_p8), %s443_s3, 4294967168  ;;  %s451_s25 = sand.u32 1, %s3264_s21   ;;  %s455_s27 = scalar_lea.vmem [#allocation5], %s3508_s29 }
  0xc9   : > { %s452_s13 = scalar_lea.sflag [#allocation6], %s451_s25 }
  0xca   : > { %3134 = dma.done.wait (%p4010_p8), %s452_s13, 256  }
  0xcb   : > { %3136 = vsyncadd (%p4010_p8), %s452_s13, 4294967040  ;;  %s464_s10 = scalar_lea.vmem [#allocation7], %s3508_s29  ;;  %p4011_p11 = scmp.eq.s32.totalorder %s3264_s21, 0 }
  0xcd   : > { %3138 = dma.done.wait (%p4011_p11), [#allocation9], 1024   ;;  %p4012_p12 = pmov %p4011_p11 }
  0xce   : > { %p4013_p1 = pmov %p4011_p11 }
  0xcf   : > { %3140 = vsyncadd (%p4012_p12), [#allocation9], 4294966272 }
  0xd0   : > { %3142 = dma.done.wait (%p4013_p1), [#allocation12], 512   ;;  %p4014_p6 = pmov %p4013_p1 }
  0xd1   : > { %v3177_v0 = vmov 0.0|0.0   ;;  %vm3178_vm0 = vmmov 0   ;;  %v3179_v1 = vmov 0.0   ;;  %vm547_vm1 = vcmask 261120   ;;  %v536_v2 = vld [vmem:[#allocation8] sm:$0xff]  ;;  %v537_v3 = vld [vmem:[#allocation8 + $0x8] sm:$0xff] }
  0xd2   : > { %3144 = vsyncadd (%p4014_p6), [#allocation12], 4294966784  ;;  %2613 = vmatprep.subr.bf16.mxu1 %v3177_v0  ;;  %2631 = vmatprep.subr.bf16.mxu0 %v3177_v0  ;;  %v538_v4 = vld [vmem:[#allocation8 + $0x10] sm:$0xff]  ;;  %v552_v5 = vand.u32 4294901760, %v536_v2  ;;  %v555_v6 = vand.u32 4294901760, %v537_v3  ;;  %v539_v7 = vld [vmem:[#allocation8 + $0x18] sm:$0xff] }
  0xd3   : > { %2423 = vmatprep.mubr.msk.f32.mxu1 %vm3178_vm0, %v3179_v1  ;;  %2456 = vmatprep.mubr.msk.f32.mxu0 %vm3178_vm0, %v3179_v1  ;;  %v558_v8 = vand.u32 4294901760, %v538_v4  ;;  %v535_v9 = vld [vmem:[%s446_s28] sm:$0xff]  ;;  %v561_v10 = vand.u32 4294901760, %v539_v7  ;;  %v3575_v33 = vld [vmem:[#allocation11] sm:$0xff]  ;;  %v3577_v34 = vld [vmem:[#allocation11 + $0x8] sm:$0xff]  ;;  %s3811_s30 = sshll.u32 %s3264_s21, 7 }
  0xd4   : > { %v549_v11 = vsel %vm547_vm1, %v535_v9, 0  ;;  %v3540_v12 = vpack.c.bf16 %v555_v6, %v552_v5  ;;  %v3542_v13 = vsub.f32 %v536_v2, %v552_v5  ;;  %v3544_v14 = vsub.f32 %v537_v3, %v555_v6  ;;  %v1538_v38 = vld [vmem:[%s464_s10] sm:$0xff]  ;;  %v3581_v40 = vld [vmem:[#allocation10] sm:$0xff]  ;;  %v3583_v41 = vld [vmem:[#allocation10 + $0x8] sm:$0xff]  ;;  %s520_s17 = scalar_lea.vmem [#allocation13], %s3508_s29  ;;  %s4015_s20 = sld [smem:[#allocation32_spill]] }
  0xd5   : > { %v3546_v15 = vsub.f32 %v538_v4, %v558_v8  ;;  %v3548_v16 = vsub.f32 %v539_v7, %v561_v10  ;;  %v3550_v17 = vand.u32 4294901760, %v549_v11  ;;  %v3554_v18 = vpack.c.bf16 %v561_v10, %v558_v8  ;;  %v1037_v42 = vld [vmem:[%s455_s27] sm:$0xff]  ;;  %v3592_v46 = vld [vmem:[#allocation11 + $0x10] sm:$0xff]  ;;  %v3594_v47 = vld [vmem:[#allocation11 + $0x18] sm:$0xff]  ;;  %s2063_s6 = sshll.u32 %s520_s17, 4  ;;  %s2040_s11 = scalar_lea.sflag [#allocation4], %s3505_s16  ;;  %s3820_s6 = int_to_ptr.vmem [resolvable:$true] %s2063_s6 }
  0xd6   : > { %2615 = vmatpush3.bf16.msra.mxu1 %v3540_v12  ;;  %2633 = vmatpush3.bf16.msra.mxu0 %v3540_v12  ;;  %v633_v19 = vand.u32 4294901760, %v3542_v13  ;;  %v640_v20 = vand.u32 4294901760, %v3544_v14  ;;  %v1554_v44 = vand.u32 4294901760, %v3575_v33  ;;  %v1557_v45 = vand.u32 4294901760, %v3577_v34  ;;  %v3603_v53 = vld [vmem:[#allocation10 + $0x10] sm:$0xff]  ;;  %v3605_v54 = vld [vmem:[#allocation10 + $0x18] sm:$0xff] }
  0xd7   : > { %v647_v21 = vand.u32 4294901760, %v3546_v15  ;;  %2616 = vmatprep.subr.bf16.mxu1 %v3177_v0  ;;  %2634 = vmatprep.subr.bf16.mxu0 %v3177_v0  ;;  %v3562_v22 = vsub.f32 %v549_v11, %v3550_v17  ;;  %v654_v23 = vand.u32 4294901760, %v3548_v16  ;;  %v1551_v48 = vsel %vm547_vm1, %v1538_v38, 0  ;;  %s3029_s14 = scalar_lea.vmem %s3820_s6, 128  ;;  %p4017_p0 = scmp.ne.s32.totalorder %s3997_s26, 0 }
  0xd8   : > { %v634_v24 = vsub.f32 %v3542_v13, %v633_v19  ;;  %v641_v25 = vsub.f32 %v3544_v14, %v640_v20  ;;  %v2638_v31 = vpack.c.bf16 %v640_v20, %v633_v19  ;;  %v1053_v50 = vand.u32 4294901760, %v3581_v40  ;;  %p3030_p10 = scmp.ne.s32.totalorder %s3820_s6, %s3029_s14  ;;  %s3180_s12 = smov [#allocation13]  }
  0xd9   : > { %v648_v26 = vsub.f32 %v3546_v15, %v647_v21  ;;  %v622_v27 = vand.u32 4294901760, %v3562_v22  ;;  %v655_v28 = vsub.f32 %v3548_v16, %v654_v23  ;;  %v2641_v43 = vpack.c.bf16 %v654_v23, %v647_v21  ;;  %s3033_s1 = sshll.u32 %s3180_s12, 4  ;;  %s3034_s1 = int_to_ptr.vmem [resolvable:$false] %s3033_s1 }
  0xda   : > { %2618 = vmatpush3.bf16.msra.mxu1 %v3554_v18  ;;  %2636 = vmatpush3.bf16.msra.mxu0 %v3554_v18  ;;  %v635_v29 = vand.u32 4294901760, %v634_v24  ;;  %v642_v30 = vand.u32 4294901760, %v641_v25  ;;  %v1056_v51 = vand.u32 4294901760, %v3583_v41  ;;  %v1050_v52 = vsel %vm547_vm1, %v1037_v42, 0  ;;  %s4016_s9 = smov %s4015_s20  ;;  %s3818_s22 = scalar_lea.hbm %s4015_s20, %s3811_s30 }
  0xdb   : > { %v623_v32 = vsub.f32 %v3562_v22, %v622_v27  ;;  %2619 = vmatprep.subr.bf16.mxu1 %v3177_v0  ;;  %2637 = vmatprep.subr.bf16.mxu0 %v3177_v0  ;;  %v649_v36 = vand.u32 4294901760, %v648_v26  ;;  %v656_v37 = vand.u32 4294901760, %v655_v28  ;;  %v3607_v55 = vand.u32 4294901760, %v1551_v48  ;;  %p3031_p4 = pnand %p3030_p10, %p4017_p0  ;;  %s3035_s3 = scalar_lea.vmem %s3034_s1, 256 }
  0xdc   : > { %v2620_v35 = vpack.c.bf16 %v642_v30, %v635_v29  ;;  %v3610_v56 = vsub.f32 %v3575_v33, %v1554_v44  ;;  %v3613_v57 = vsub.f32 %v3577_v34, %v1557_v45  ;;  %v1560_v58 = vand.u32 4294901760, %v3592_v46  ;;  %p3036_p13 = scmp.lt.s32.totalorder %s3820_s6, %s3034_s1  ;;  %p3037_p7 = scmp.lt.s32.totalorder %s3035_s3, %s3029_s14 }
  0xdd   : > { %v624_v39 = vand.u32 4294901760, %v623_v32  ;;  %2457 = vmatmul.mubr.f32.vlgmr.msra.gmra.mrb[0].mxu0 %v622_v27  ;;  %v2623_v49 = vpack.c.bf16 %v656_v37, %v649_v36  ;;  %v1563_v59 = vand.u32 4294901760, %v3594_v47  ;;  %v2626_v60 = vpack.c.bf16 %v3544_v14, %v3542_v13  ;;  %p3032_p9 = pneg %p3031_p4 }
  0xde   : > { %2639 = vmatpush3.bf16.msra.mxu0 %v2638_v31  ;;  %2467 = vmatprep.mubr.msk.f32.mxu0 %vm3178_vm0, %v3179_v1  ;;  %v3620_v61 = vand.u32 4294901760, %v1050_v52  ;;  %v3623_v62 = vsub.f32 %v3581_v40, %v1053_v50  ;;  %v3626_v63 = vsub.f32 %v3583_v41, %v1056_v51  ;;  %v1059_v2 = vand.u32 4294901760, %v3603_v53  ;;  %p3038_p3 = por %p3037_p7, %p3036_p13 }
  0xdf   : > { %2424 = vmatmul.mubr.f32.vlgmr.msra.gmra.mrb[0].mxu1 %v624_v39  ;;  %2640 = vmatprep.subr.bf16.mxu0 %v3177_v0  ;;  %v1062_v3 = vand.u32 4294901760, %v3605_v54  ;;  %v3633_v4 = vsub.f32 %v1551_v48, %v3607_v55  ;;  %v3639_v5 = vsub.f32 %v3592_v46, %v1560_v58  ;;  %v3642_v6 = vsub.f32 %v3594_v47, %v1563_v59 }
  0xe0   : > { %2621 = vmatpush3.bf16.msra.mxu1 %v2620_v35  ;;  %2434 = vmatprep.mubr.msk.f32.mxu1 %vm3178_vm0, %v3179_v1  ;;  %v1635_v7 = vand.u32 4294901760, %v3610_v56  ;;  %v1642_v8 = vand.u32 4294901760, %v3613_v57  ;;  %v2629_v9 = vpack.c.bf16 %v3548_v16, %v3546_v15  ;;  %v3651_v10 = vsub.f32 %v1050_v52, %v3620_v61  ;;  %p3039_p5 = pnand %p3038_p3, %p3032_p9 }
  0xe1   : > { %2622 = vmatprep.subr.bf16.mxu1 %v3177_v0  ;;  %v3656_v11 = vsub.f32 %v3603_v53, %v1059_v2  ;;  %v1134_v13 = vand.u32 4294901760, %v3623_v62  ;;  %v1141_v14 = vand.u32 4294901760, %v3626_v63  ;;  %v3664_v15 = vpack.c.bf16 %v1557_v45, %v1554_v44 }
  0xe2   : > { %2642 = vmatpush3.bf16.msra.mxu0 %v2641_v43  ;;  %v1624_v16 = vand.u32 4294901760, %v3633_v4  ;;  %v1636_v19 = vsub.f32 %v3610_v56, %v1635_v7  ;;  %v1643_v20 = vsub.f32 %v3613_v57, %v1642_v8  ;;  %v1649_v21 = vand.u32 4294901760, %v3639_v5 }
  0xe3   : > { %2643 = vmatprep.subr.bf16.mxu0 %v3177_v0  ;;  %v1656_v23 = vand.u32 4294901760, %v3642_v6  ;;  %v3677_v24 = vpack.c.bf16 %v1056_v51, %v1053_v50  ;;  %v1123_v25 = vand.u32 4294901760, %v3651_v10  ;;  %v1142_v26 = vsub.f32 %v3626_v63, %v1141_v14 }
  0xe4   : > { %2624 = vmatpush3.bf16.msra.mxu1 %v2623_v49  ;;  %v1148_v27 = vand.u32 4294901760, %v3656_v11  ;;  %v3690_v29 = vpack.c.bf16 %v1563_v59, %v1560_v58  ;;  %v1625_v30 = vsub.f32 %v3633_v4, %v1624_v16  ;;  %v1637_v31 = vand.u32 4294901760, %v1636_v19  ;;  %v2314_v58 = vld [vmem:[%s3943_s4] ss:$0 sm:$0xff] }
  0xe5   : > { %2625 = vmatprep.subr.bf16.mxu1 %v3177_v0  ;;  %2468 = vmatmul.mubr.f32.vlgmr.msra.gmra.mrb[0].mxu0 %v3550_v17  ;;  %v1644_v32 = vand.u32 4294901760, %v1643_v20  ;;  %v1650_v33 = vsub.f32 %v3639_v5, %v1649_v21  ;;  %v3706_v34 = vpack.c.bf16 %v1062_v3, %v1059_v2  ;;  %v1124_v35 = vsub.f32 %v3651_v10, %v1123_v25 }
  0xe6   : > { %2645 = vmatpush3.bf16.msra.mxu0 %v3540_v12  ;;  %2478 = vmatprep.mubr.msk.f32.mxu0 %vm3178_vm0, %v3179_v1  ;;  %v3659_v12 = vsub.f32 %v3605_v54, %v1062_v3  ;;  %v1143_v37 = vand.u32 4294901760, %v1142_v26  ;;  %v1149_v38 = vsub.f32 %v3656_v11, %v1148_v27  ;;  %v1626_v39 = vand.u32 4294901760, %v1625_v30 }
  0xe7   : > { %2435 = vmatmul.mubr.f32.vlgmr.msra.gmra.mrb[0].mxu1 %v3550_v17  ;;  %2646 = vmatprep.subr.bf16.mxu0 %v3177_v0  ;;  %v2692_v40 = vpack.c.bf16 %v1644_v32, %v1637_v31  ;;  %v1651_v41 = vand.u32 4294901760, %v1650_v33  ;;  %v1125_v43 = vand.u32 4294901760, %v1124_v35  ;;  %v2698_v49 = vpack.c.bf16 %v3613_v57, %v3610_v56 }
  0xe8   : > { %2627 = vmatpush3.bf16.msra.mxu1 %v2626_v60  ;;  %2445 = vmatprep.mubr.msk.f32.mxu1 %vm3178_vm0, %v3179_v1  ;;  %v1155_v28 = vand.u32 4294901760, %v3659_v12  ;;  %v1150_v45 = vand.u32 4294901760, %v1149_v38  ;;  %v2662_v50 = vpack.c.bf16 %v3626_v63, %v3623_v62  ;;  %v2701_v51 = vpack.c.bf16 %v3642_v6, %v3639_v5 }
  0xe9   : > { %2628 = vmatprep.subr.bf16.mxu1 %v3177_v0  ;;  %v2665_v52 = vpack.c.bf16 %v3659_v12, %v3656_v11  ;;  %v2710_v53 = vpack.c.bf16 %v1642_v8, %v1635_v7  ;;  %v2674_v54 = vpack.c.bf16 %v1141_v14, %v1134_v13  ;;  %v2713_v56 = vpack.c.bf16 %v1656_v23, %v1649_v21 }
  0xea   : > { %2648 = vmatpush3.bf16.msra.mxu0 %v3554_v18  ;;  %v1135_v18 = vsub.f32 %v3623_v62, %v1134_v13  ;;  %v2677_v57 = vpack.c.bf16 %v1155_v28, %v1148_v27 }
  0xeb   : > { %2685 = vmatprep.subr.bf16.mxu0 %v3177_v0 }
  0xec   : > { %2630 = vmatpush3.bf16.msra.mxu1 %v2629_v9  ;;  %v1136_v36 = vand.u32 4294901760, %v1135_v18 }
  0xed   : > { %2479 = vmatmul.mubr.f32.vlgmr.msra.gmra.mrb[0].mxu0 %v3550_v17  ;;  %2649 = vmatprep.subr.bf16.mxu1 %v3177_v0  ;;  %v1657_v17 = vsub.f32 %v3642_v6, %v1656_v23 }
  0xee   : > { %2687 = vmatpush3.bf16.msra.mxu0 %v3664_v15  ;;  %2555 = vmatprep.mubr.msk.f32.mxu0 %vm3178_vm0, %v3179_v1  ;;  %v2656_v44 = vpack.c.bf16 %v1143_v37, %v1136_v36 }
  0xef   : > { %2446 = vmatmul.mubr.f32.vlgmr.msra.gmra.mrb[0].mxu1 %v3562_v22  ;;  %2688 = vmatprep.subr.bf16.mxu0 %v3177_v0  ;;  %v1156_v22 = vsub.f32 %v3659_v12, %v1155_v28  ;;  %v1658_v42 = vand.u32 4294901760, %v1657_v17 }
  0xf0   : > { %2651 = vmatpush3.bf16.msra.mxu1 %v3677_v24  ;;  %2489 = vmatprep.mubr.msk.f32.mxu1 %vm3178_vm0, %v3179_v1 }
  0xf1   : > { %2652 = vmatprep.subr.bf16.mxu1 %v3177_v0  ;;  %v1157_v46 = vand.u32 4294901760, %v1156_v22  ;;  %v2695_v47 = vpack.c.bf16 %v1658_v42, %v1651_v41 }
  0xf2   : > { %2690 = vmatpush3.bf16.msra.mxu0 %v3690_v29 }
  0xf3   : > { %2691 = vmatprep.subr.bf16.mxu0 %v3177_v0  ;;  %v2659_v48 = vpack.c.bf16 %v1157_v46, %v1150_v45 }
  0xf4   : > { %2654 = vmatpush3.bf16.msra.mxu1 %v3706_v34 }
  0xf5   : > { %2655 = vmatprep.subr.bf16.mxu1 %v3177_v0  ;;  %2556 = vmatmul.mubr.f32.vlgmr.msra.gmra.mrb[2].mxu0 %v1626_v39 }
  0xf6   : > { %2693 = vmatpush3.bf16.msra.mxu0 %v2692_v40  ;;  %2566 = vmatprep.mubr.msk.f32.mxu0 %vm3178_vm0, %v3179_v1 }
  0xf7   : > { %2490 = vmatmul.mubr.f32.vlgmr.msra.gmra.mrb[2].mxu1 %v1125_v43  ;;  %2694 = vmatprep.subr.bf16.mxu0 %v3177_v0 }
  0xf8   : > { %2657 = vmatpush3.bf16.msra.mxu1 %v2656_v44  ;;  %2500 = vmatprep.mubr.msk.f32.mxu1 %vm3178_vm0, %v3179_v1 }
  0xf9   : > { %2658 = vmatprep.subr.bf16.mxu1 %v3177_v0 }
  0xfa   : > { %2696 = vmatpush3.bf16.msra.mxu0 %v2695_v47 }
  0xfb   : > { %2697 = vmatprep.subr.bf16.mxu0 %v3177_v0 }
  0xfc   : > { %2660 = vmatpush3.bf16.msra.mxu1 %v2659_v48 }
  0xfd   : > { %2661 = vmatprep.subr.bf16.mxu1 %v3177_v0  ;;  %2567 = vmatmul.mubr.f32.vlgmr.msra.gmra.mrb[2].mxu0 %v3607_v55 }
  0xfe   : > { %2699 = vmatpush3.bf16.msra.mxu0 %v2698_v49  ;;  %2577 = vmatprep.mubr.msk.f32.mxu0 %vm3178_vm0, %v3179_v1 }
  0xff   : > { %2501 = vmatmul.mubr.f32.vlgmr.msra.gmra.mrb[2].mxu1 %v3620_v61  ;;  %2700 = vmatprep.subr.bf16.mxu0 %v3177_v0 }
 0x100   : > { %2663 = vmatpush3.bf16.msra.mxu1 %v2662_v50  ;;  %2511 = vmatprep.mubr.msk.f32.mxu1 %vm3178_vm0, %v3179_v1 }
 0x101   : > { %2664 = vmatprep.subr.bf16.mxu1 %v3177_v0 }
 0x102   : > { %2702 = vmatpush3.bf16.msra.mxu0 %v2701_v51 }
 0x103   : > { %2703 = vmatprep.subr.bf16.mxu0 %v3177_v0 }
 0x104   : > { %2666 = vmatpush3.bf16.msra.mxu1 %v2665_v52 }
 0x105   : > { %2667 = vmatprep.subr.bf16.mxu1 %v3177_v0  ;;  %2578 = vmatmul.mubr.f32.vlgmr.msra.gmra.mrb[2].mxu0 %v3633_v4 }
 0x106   : > { %2705 = vmatpush3.bf16.msra.mxu0 %v3664_v15  ;;  %2588 = vmatprep.mubr.msk.f32.mxu0 %vm3178_vm0, %v3179_v1 }
 0x107   : > { %2512 = vmatmul.mubr.f32.vlgmr.msra.gmra.mrb[2].mxu1 %v3651_v10  ;;  %2706 = vmatprep.subr.bf16.mxu0 %v3177_v0 }
 0x108   : > { %2669 = vmatpush3.bf16.msra.mxu1 %v3677_v24  ;;  %2522 = vmatprep.mubr.msk.f32.mxu1 %vm3178_vm0, %v3179_v1 }
 0x109   : > { %2670 = vmatprep.subr.bf16.mxu1 %v3177_v0 }
 0x10a   : > { %2708 = vmatpush3.bf16.msra.mxu0 %v3690_v29 }
 0x10b   : > { %2709 = vmatprep.subr.bf16.mxu0 %v3177_v0 }
 0x10c   : > { %2672 = vmatpush3.bf16.msra.mxu1 %v3706_v34 }
 0x10d   : > { %2673 = vmatprep.subr.bf16.mxu1 %v3177_v0  ;;  %2589 = vmatmul.mubr.f32.vlgmr.msra.gmra.mrb[2].mxu0 %v1624_v16 }
 0x10e   : > { %2711 = vmatpush3.bf16.msra.mxu0 %v2710_v53  ;;  %2599 = vmatprep.mubr.msk.f32.mxu0 %vm3178_vm0, %v3179_v1 }
 0x10f   : > { %2523 = vmatmul.mubr.f32.vlgmr.msra.gmra.mrb[2].mxu1 %v1123_v25  ;;  %2712 = vmatprep.subr.bf16.mxu0 %v3177_v0 }
 0x110   : > { %2675 = vmatpush3.bf16.msra.mxu1 %v2674_v54  ;;  %2533 = vmatprep.mubr.msk.f32.mxu1 %vm3178_vm0, %v3179_v1 }
 0x111   : > { %2676 = vmatprep.subr.bf16.mxu1 %v3177_v0 }
 0x112   : > { %2714 = vmatpush3.bf16.msra.mxu0 %v2713_v56 }
 0x113   : > { %2715 = vmatprep.subr.bf16.mxu0 %v3177_v0 }
 0x114   : > { %2678 = vmatpush3.bf16.msra.mxu1 %v2677_v57 }
 0x115   : > { %2679 = vmatprep.subr.bf16.mxu1 %v3177_v0  ;;  %2600 = vmatmul.mubr.f32.vlgmr.msra.gmra.mrb[2].mxu0 %v3607_v55 }
 0x116   : > { %2717 = vmatpush3.bf16.msra.mxu0 %v3664_v15  ;;  %2610 = vmatprep.mubr.msk.f32.mxu0 %vm3178_vm0, %v3179_v1 }
 0x117   : > { %2534 = vmatmul.mubr.f32.vlgmr.msra.gmra.mrb[2].mxu1 %v3620_v61  ;;  %2718 = vmatprep.subr.bf16.mxu0 %v3177_v0 }
 0x118   : > { %2681 = vmatpush3.bf16.msra.mxu1 %v3677_v24  ;;  %2544 = vmatprep.mubr.msk.f32.mxu1 %vm3178_vm0, %v3179_v1 }
 0x119   : > { %2682 = vmatprep.subr.bf16.mxu1 %v3177_v0 }
 0x11a   : > { %2720 = vmatpush3.bf16.msra.mxu0 %v3690_v29 }
 0x11c   : > { %2684 = vmatpush3.bf16.msra.mxu1 %v3706_v34 }
 0x11d   : > { %2611 = vmatmul.mubr.f32.vlgmr.msra.gmra.mrb[2].mxu0 %v3607_v55 }
 0x11f   : > { %2545 = vmatmul.mubr.f32.vlgmr.msra.gmra.mrb[2].mxu1 %v3620_v61 }
 0x1c0   : > { %v1032_v59 = vpop.f32.mrb[0].mxu0 }
 0x1c1   : > { %v2480_v60 = vpop.f32.mrb[1].mxu0 }
 0x1c2   : > { %v797_v62 = vpop.f32.mrb[0].mxu1 }
 0x1c3   : > { %v2721_v0 = vadd.f32 %v2314_v58, %v797_v62  ;;  %v2447_v1 = vpop.f32.mrb[1].mxu1 }
 0x1c5   : > { %v2722_v63 = vadd.f32 %v2721_v0, %v1032_v59 }
 0x1c7   : > { %1036 = vst.msk [vmem:[%s520_s17] sm:$0xff] %vm547_vm1, %v2722_v63 }
 0x1c8   : > { %3042 = shalt.err (!%p3039_p5)
}
 0x1c9   : > { %s3043_s16 = scalar_lea.hbm %s3818_s22, 128  ;;  %s3047_s27 = scalar_lea.hbm %s4016_s9, 256 }
 0x1ca   : > { %p3044_p2 = scmp.ne.s32.totalorder %s3818_s22, %s3043_s16  ;;  %p3048_p12 = scmp.lt.u32.totalorder %s3818_s22, %s4016_s9 }
 0x1cb   : > { %p3049_p1 = scmp.lt.u32.totalorder %s3047_s27, %s3043_s16  ;;  %p3051_p10 = scmp.lt.u32.totalorder %s3043_s16, %s3818_s22 }
 0x1cc   : > { %p3045_p8 = pnand %p3044_p2, %p4017_p0 }
 0x1cd   : > { %p3050_p6 = por %p3049_p1, %p3048_p12 }
 0x1ce   : > { %p3046_p11 = pneg %p3045_p8 }
 0x1cf   : > { %p3052_p4 = por %p3051_p10, %p3050_p6 }
 0x1d1   : > { %p3053_p9 = pnand %p3052_p4, %p3046_p11 }
 0x1d3   : > { %3056 = shalt.err (!%p3053_p9)
}
 0x1d4   : > { %2771 = dma.vmem_to_hbm [thread:$0]  (%p4017_p0), %s3820_s6, 128, %s3818_s22, %s2040_s11  }
 0x1d5   : > { %s4018_s15 = sld [smem:[#allocation31_spill]]  ;;  %s4019_s14 = sld [smem:[#allocation30_spill]] }
 0x1d6   : > { %s527_s12 = scalar_lea.vmem [#allocation14], %s3508_s29  ;;  %s534_s3 = scalar_lea.vmem [#allocation16], %s3508_s29 }
 0x1d7   : > { %s2076_s1 = sshll.u32 %s527_s12, 4  ;;  %s2089_s16 = sshll.u32 %s534_s3, 4  ;;  %s3859_s1 = int_to_ptr.vmem [resolvable:$true] %s2076_s1  ;;  %s3868_s16 = int_to_ptr.vmem [resolvable:$true] %s2089_s16 }
 0x1d8   : > { %s4020_s11 = sld [smem:[#allocation33_spill]]  ;;  %s4021_s10 = sld [smem:[#allocation34_spill]] }
 0x1d9   : > { %s3873_s23 = scalar_lea.sflag [#allocation15], %s451_s25  ;;  %s3057_s24 = scalar_lea.vmem %s3859_s1, 128 }
 0x1da   : > { %p3058_p13 = scmp.ne.s32.totalorder %s3859_s1, %s3057_s24  ;;  %s3181_s17 = smov [#allocation14]  }
 0x1db   : > { %v2316_v55 = vld [vmem:[%s4018_s15] ss:$0 sm:$0xff]  ;;  %s3061_s15 = sshll.u32 %s3181_s17, 4  ;;  %s3062_s15 = int_to_ptr.vmem [resolvable:$false] %s3061_s15 }
 0x1dc   : > { %v2315_v61 = vld [vmem:[%s4019_s14] ss:$0 sm:$0xff]  ;;  %p3059_p7 = pnand %p3058_p13, %p4017_p0  ;;  %s3063_s8 = scalar_lea.vmem %s3062_s15, 256 }
 0x1dd   : > { %p3064_p5 = scmp.lt.s32.totalorder %s3859_s1, %s3062_s15  ;;  %p3065_p2 = scmp.lt.s32.totalorder %s3063_s8, %s3057_s24 }
 0x1de   : > { %s3857_s28 = scalar_lea.hbm %s4020_s11, %s3811_s30  ;;  %s3866_s29 = scalar_lea.hbm %s4021_s10, %s3811_s30 }
 0x1df   : > { %p3060_p3 = pneg %p3059_p7  ;;  %p3066_p8 = por %p3065_p2, %p3064_p5 }
 0x1e1   : > { %p3067_p11 = pnand %p3066_p8, %p3060_p3 }
 0x1f0   : > { %v2034_v2 = vpop.f32.mrb[2].mxu0 }
 0x1f1   : > { %v2724_v3 = vadd.f32 %v2316_v55, %v2034_v2  ;;  %v2612_v4 = vpop.f32.mrb[3].mxu0 }
 0x1f2   : > { %v1533_v5 = vpop.f32.mrb[2].mxu1 }
 0x1f3   : > { %v2723_v6 = vadd.f32 %v2315_v61, %v1533_v5  ;;  %v2546_v7 = vpop.f32.mrb[3].mxu1  ;;  %2038 = vst.msk [vmem:[%s534_s3] sm:$0xff] %vm547_vm1, %v2724_v3 }
 0x1f5   : > { %1537 = vst.msk [vmem:[%s527_s12] sm:$0xff] %vm547_vm1, %v2723_v6 }
 0x1f6   : > { %3070 = shalt.err (!%p3067_p11)
}
 0x1f7   : > { %s3071_s21 = scalar_lea.hbm %s3857_s28, 128  ;;  %s3075_s20 = scalar_lea.hbm %s4020_s11, 256 }
 0x1f8   : > { %p3072_p12 = scmp.ne.s32.totalorder %s3857_s28, %s3071_s21  ;;  %p3076_p10 = scmp.lt.u32.totalorder %s3857_s28, %s4020_s11 }
 0x1f9   : > { %p3077_p4 = scmp.lt.u32.totalorder %s3075_s20, %s3071_s21  ;;  %p3079_p13 = scmp.lt.u32.totalorder %s3071_s21, %s3857_s28 }
 0x1fa   : > { %p3073_p1 = pnand %p3072_p12, %p4017_p0 }
 0x1fb   : > { %p3078_p9 = por %p3077_p4, %p3076_p10 }
 0x1fc   : > { %p3074_p6 = pneg %p3073_p1 }
 0x1fd   : > { %p3080_p7 = por %p3079_p13, %p3078_p9 }
 0x1ff   : > { %p3081_p3 = pnand %p3080_p7, %p3074_p6 }
 0x201   : > { %3084 = shalt.err (!%p3081_p3)
}
 0x202   : > { %2772 = dma.vmem_to_hbm [thread:$0]  (%p4017_p0), %s3859_s1, 128, %s3857_s28, %s3873_s23  }
 0x203   : > { %s3085_s3 = scalar_lea.vmem %s3868_s16, 128  ;;  %s3182_s6 = smov [#allocation16]  }
 0x204   : > { %p3086_p5 = scmp.ne.s32.totalorder %s3868_s16, %s3085_s3  ;;  %s3089_s22 = sshll.u32 %s3182_s6, 4  ;;  %s3090_s22 = int_to_ptr.vmem [resolvable:$false] %s3089_s22 }
 0x205   : > { %s3091_s13 = scalar_lea.vmem %s3090_s22, 256  ;;  %p3092_p11 = scmp.lt.s32.totalorder %s3868_s16, %s3090_s22 }
 0x206   : > { %p3087_p2 = pnand %p3086_p5, %p4017_p0  ;;  %p3093_p12 = scmp.lt.s32.totalorder %s3091_s13, %s3085_s3 }
 0x208   : > { %p3088_p8 = pneg %p3087_p2  ;;  %p3094_p1 = por %p3093_p12, %p3092_p11 }
 0x20a   : > { %p3095_p6 = pnand %p3094_p1, %p3088_p8 }
 0x20c   : > { %3098 = shalt.err (!%p3095_p6)
}
 0x20d   : > { %s3099_s1 = scalar_lea.hbm %s3866_s29, 128  ;;  %s3103_s24 = scalar_lea.hbm %s4021_s10, 256 }
 0x20e   : > { %p3100_p10 = scmp.ne.s32.totalorder %s3866_s29, %s3099_s1  ;;  %p3104_p13 = scmp.lt.u32.totalorder %s3866_s29, %s4021_s10 }
 0x20f   : > { %p3105_p7 = scmp.lt.u32.totalorder %s3103_s24, %s3099_s1  ;;  %p3107_p5 = scmp.lt.u32.totalorder %s3099_s1, %s3866_s29 }
 0x210   : > { %p3101_p4 = pnand %p3100_p10, %p4017_p0 }
 0x211   : > { %p3106_p3 = por %p3105_p7, %p3104_p13 }
 0x212   : > { %p3102_p9 = pneg %p3101_p4 }
 0x213   : > { %p3108_p2 = por %p3107_p5, %p3106_p3 }
 0x215   : > { %p3109_p8 = pnand %p3108_p2, %p3102_p9 }
 0x217   : > { %3112 = shalt.err (!%p3109_p8)
}
 0x218   : > { %2773 = dma.vmem_to_hbm [thread:$0]  (%p4017_p0), %s3868_s16, 128, %s3866_s29, %s3873_s23  }
 0x219 PF: > { %s4022_s8 = sld [smem:[#allocation23_spill]]  ;;  %s4023_s21 = sld [smem:[#allocation25_spill]] }
 0x21a   : > { %s4024_s25 = sld [smem:[#allocation24_spill]] }
 0x21f   : > { %s2101_s30 = sand.u32 1, %s4022_s8   ;;  %p4025_p11 = scmp.ne.s32.totalorder %s4023_s21, 0 }
 0x220   : > { %p4026_p12 = scmp.ge.s32.totalorder %s4024_s25, 2  ;;  %s2102_s20 = scalar_lea.sflag [#allocation4], %s2101_s30 }
 0x222   : > { %p2798_p1 = pnand %p4026_p12, %p4025_p11 }
 0x224   : > { %3146 = dma.done.wait (!%p2798_p1), %s2102_s20, 128  }
 0x225   : > { %3148 = vsyncadd (!%p2798_p1), %s2102_s20, 4294967168  ;;  %s4027_s14 = sadd.s32 4294967294, %s4024_s25  }
 0x226   : > { %s2110_s12 = sand.u32 1, %s4027_s14  }
 0x227   : > { %s2111_s3 = scalar_lea.sflag [#allocation15], %s2110_s12 }
 0x228   : > { %3150 = dma.done.wait (!%p2798_p1), %s2111_s3, 256  }
 0x229   : > { %3152 = vsyncadd (!%p2798_p1), %s2111_s3, 4294967040  ;;  %s4028_s20 = sld [smem:[#allocation26_spill]]  ;;  %s4029_s26 = sld [smem:[#allocation27_spill]] }
 0x22a   : > { %s4030_s17 = smov %s3159_s18  ;;  %s4031_s18 = smov %s3163_s19 }
 0x22f   : > { %p33_p0 = scmp.ge.s32.totalorder %s4028_s20, 4   ;;  %s4032_s19 = smov %s4029_s26 }
 0x231   :  { %35 = sbr.rel (!%p33_p0) target bundleno = 19 (0x13), region = 169 }
 0x238   :  { %2125 = vsyncpa [#allocation3], 1 }
 0x239   :  { %2127 = vsyncpa [#allocation3 + $0x1], 1 }
 0x23a   :  { %2128 = vsyncpa [#allocation6], 1 }
 0x23b   :  { %2130 = vsyncpa [#allocation6 + $0x1], 1 }
 0x23c   :  { %2131 = vsyncpa [#allocation9], 1 }
 0x23d   :  { %2132 = vsyncpa [#allocation12], 1 }
 0x23e   :  { %2133 = vsyncpa [#allocation4], 1 }
 0x23f   :  { %2135 = vsyncpa [#allocation4 + $0x1], 1 }
 0x240   :  { %2136 = vsyncpa [#allocation15], 1 }
 0x241   :  { %2138 = vsyncpa [#allocation15 + $0x1], 1 }

</bundles_post_ra>
